<compile_context>
chip_gen: v7x
topology: tpu7x:2x2x1
jax: 0.10.0
libtpu: 0.0.40
codegen_flags: <defaults>
</compile_context>

<pallas_src>
import jax
import jax.numpy as jnp
from jax.experimental import pallas as pl
from jax.experimental.pallas import tpu as pltpu

NUM_CELLS = 4
NUM_LAYER_ROUTING = 3
EMBED_SIZE = 32  # args.embed_size
PATH_HID = 128   # path_mapping hidden (defined in __init__, unused by forward; kept for parity)


# ----------------------------- Pallas kernels (hot path) -----------------------------

def _fused_gram_small_kernel(*refs):
    """VPU partial-Gram accumulation for small shapes.

    refs = (piece_0, ..., piece_{n-1}, out); piece_k: (B, S, P_k) f32, out: (B, S, S) f32.
    out[b] = sum_k piece_k[b] @ piece_k[b]^T, computed as broadcast-mul + lane reduce
    (no MXU push/pop at these tiny M/N/K).
    """
    *piece_refs, o_ref = refs
    B = o_ref.shape[0]
    for b in range(B):                      # static, tiny; unrolled at trace time
        acc = None
        for r in piece_refs:
            x = r[b, :, :]                  # (S, P_k)
            pg = jnp.sum(x[:, None, :] * x[None, :, :], axis=-1)  # (S, S)
            acc = pg if acc is None else acc + pg
        o_ref[b, :, :] = acc


def _make_tiled_gram_kernel(n_pieces):
    """MXU partial-Gram accumulation for one lane-dense (TM, TN) output tile.

    refs = (x_0..x_{n-1}, xt_0..xt_{n-1}, out); x_k: (TM, P_k) bf16 (row tile),
    xt_k: (P_k, TN) bf16 (pre-transposed col tile), out: (TM, TN) f32.
    """
    def kernel(*refs):
        xs = refs[:n_pieces]
        xts = refs[n_pieces:2 * n_pieces]
        o_ref = refs[2 * n_pieces]
        acc = None
        for xr, xtr in zip(xs, xts):
            pg = jnp.dot(xr[...], xtr[...], preferred_element_type=jnp.float32)
            acc = pg if acc is None else acc + pg
        o_ref[...] = acc
    return kernel


def _sim_paths_small(pieces):
    B, S, _ = pieces[0].shape
    p_total = sum(p.shape[-1] for p in pieces)
    cost = pl.CostEstimate(
        flops=2 * B * S * S * p_total,
        transcendentals=0,
        bytes_accessed=sum(p.size * p.dtype.itemsize for p in pieces) + B * S * S * 4,
    )
    return pl.pallas_call(
        _fused_gram_small_kernel,
        out_shape=jax.ShapeDtypeStruct((B, S, S), jnp.float32),
        grid=(1,),  # single step: all images in one block
        in_specs=[pl.BlockSpec((B, S, p.shape[-1]), lambda i: (0, 0, 0)) for p in pieces],
        out_specs=pl.BlockSpec((B, S, S), lambda i: (0, 0, 0)),
        cost_estimate=cost,
    )(*pieces)


def _pick_tile(s):
    for t in (1024, 512, 256, 128):
        if s % t == 0:
            return t
    return None


def _sim_paths_tiled(pieces):
    """HBM-bound at scale: bf16 inputs, f32 accumulation, lane-dense output tiles."""
    B, S, _ = pieces[0].shape
    tile = _pick_tile(S)
    xs = [p.astype(jnp.bfloat16) for p in pieces]
    # Pre-transpose the RHS in the wrapper so the kernel contracts (M,K)x(K,N) directly.
    xts = [jnp.swapaxes(x, 1, 2) for x in xs]            # (B, P_k, S)
    n = len(xs)

    in_specs = []
    for x in xs:
        pk = x.shape[-1]
        in_specs.append(pl.BlockSpec((None, tile, pk), lambda b, i, j: (b, i, 0)))
    for xt in xts:
        pk = xt.shape[1]
        in_specs.append(pl.BlockSpec((None, pk, tile), lambda b, i, j: (b, 0, j)))
    out_spec = pl.BlockSpec((None, tile, tile), lambda b, i, j: (b, i, j))

    p_total = sum(x.shape[-1] for x in xs)
    cost = pl.CostEstimate(
        flops=2 * B * S * S * p_total,
        transcendentals=0,
        bytes_accessed=2 * sum(x.size * x.dtype.itemsize for x in xs) + B * S * S * 4,
    )
    return pl.pallas_call(
        _make_tiled_gram_kernel(n),
        out_shape=jax.ShapeDtypeStruct((B, S, S), jnp.float32),
        grid=(B, S // tile, S // tile),
        in_specs=in_specs,
        out_specs=out_spec,
        compiler_params=pltpu.CompilerParams(
            # No cross-step state (K fully folded into one pass per tile) -> all axes
            # independent; "parallel" lets v7x's two TensorCores split the grid.
            dimension_semantics=("parallel", "parallel", "parallel")),
        cost_estimate=cost,
    )(*xs, *xts)


def compute_sim_paths(pieces):
    """sim_paths = matmul(paths.squeeze(-2), paths.squeeze(-2).transpose(-1,-2)) (torch semantics),
    where paths = concat(pieces, -1). The concat is never materialized for the kernel: partial
    Grams of the pieces are accumulated inside one pallas_call.
    pieces: list of (n_img, n_stc, P_k) float arrays.
    """
    n_img, n_stc = pieces[0].shape[:2]
    pieces = [p.astype(jnp.float32) for p in pieces]

    squeeze_out = False
    if n_stc == 1:
        # torch .squeeze(-2) drops the size-1 dim -> Gram over images: (n_img, n_img).
        pieces = [p.reshape(1, n_img, p.shape[-1]) for p in pieces]
        squeeze_out = True

    B, S, _ = pieces[0].shape
    if S < 128:
        out = _sim_paths_small(pieces)
    else:
        sp = ((S + 127) // 128) * 128
        if sp != S:   # zero rows contribute zero partial products
            pieces = [jnp.pad(p, ((0, 0), (0, sp - S), (0, 0))) for p in pieces]
        out = _sim_paths_tiled(pieces)
        if sp != S:
            out = out[:, :S, :S]
    return out[0] if squeeze_out else out


# ------------------- deterministic surrogate interaction layers (glue) -------------------

def init_params(key, D=EMBED_SIZE, num_cells=NUM_CELLS, num_layer_routing=NUM_LAYER_ROUTING):
    ks = jax.random.split(key, 8)
    params = {
        # layer 0: candidate transforms on pair features (2D -> D) and a router (2D -> C*C)
        "l0_Wc": 0.1 * jax.random.normal(ks[0], (num_cells, 2 * D, D), jnp.float32),
        "l0_Wr": 0.1 * jax.random.normal(ks[1], (2 * D, num_cells * num_cells), jnp.float32),
        # middle layers (num_layer_routing - 2 of them)
        "l1": [],
        # final layer: C -> 1
        "l2_Wc": 0.1 * jax.random.normal(ks[2], (num_cells, D, D), jnp.float32),
        "l2_Wr": 0.1 * jax.random.normal(ks[3], (D, 1 * num_cells), jnp.float32),
        # defined in __init__ but unused by forward (kept for parity)
        "path_mapping_W": 0.1 * jax.random.normal(
            ks[4], (num_cells ** 2 * (num_layer_routing - 1) + num_cells, PATH_HID), jnp.float32),
        "bn_gamma": jnp.ones((D,), jnp.float32),
        "bn_beta": jnp.zeros((D,), jnp.float32),
    }
    mk = jax.random.split(ks[5], max(num_layer_routing - 2, 1))
    for i in range(num_layer_routing - 2):
        sk = jax.random.split(mk[i], 2)
        params["l1"].append({
            "Wc": 0.1 * jax.random.normal(sk[0], (num_cells, D, D), jnp.float32),
            "Wr": 0.1 * jax.random.normal(sk[1], (D, num_cells * num_cells), jnp.float32),
        })
    return params


def _pair_features(text, image):
    # text: (n_stc, L, D), image: (n_img, R, D)
    t = text.mean(axis=1)   # (n_stc, D)
    v = image.mean(axis=1)  # (n_img, D)
    n_stc, D = t.shape
    n_img = v.shape[0]
    tb = jnp.broadcast_to(t[None, :, :], (n_img, n_stc, D))
    vb = jnp.broadcast_to(v[:, None, :], (n_img, n_stc, D))
    return jnp.concatenate([vb, tb], axis=-1)  # (n_img, n_stc, 2D)


def dynamic_itr_l0(params, text, image):
    pair = _pair_features(text, image)                                    # (B, S, 2D)
    cands = jnp.tanh(jnp.einsum("bsd,cdh->cbsh", pair, params["l0_Wc"]))  # (C, B, S, D)
    logits = pair @ params["l0_Wr"]                                       # (B, S, C*C)
    B, S = pair.shape[:2]
    paths = jax.nn.softmax(logits.reshape(B, S, NUM_CELLS, NUM_CELLS), axis=-1)  # (B, S, out, in)
    outs = jnp.einsum("bsoi,ibsh->obsh", paths, cands)                    # (out, B, S, D)
    return [outs[j] for j in range(NUM_CELLS)], paths


def dynamic_itr_layer(Wc, Wr, pairs_emb_lst, out_cells):
    stack = jnp.stack(pairs_emb_lst, axis=0)                              # (in, B, S, D)
    cands = jnp.tanh(jnp.einsum("ibsd,idh->ibsh", stack, Wc))             # (in, B, S, D)
    feat = stack.mean(axis=0)                                             # (B, S, D)
    logits = feat @ Wr                                                    # (B, S, out*in)
    B, S = feat.shape[:2]
    paths = jax.nn.softmax(logits.reshape(B, S, out_cells, stack.shape[0]), axis=-1)
    outs = jnp.einsum("bsoi,ibsh->obsh", paths, cands)                    # (out, B, S, D)
    return [outs[j] for j in range(out_cells)], paths


def interaction_module_routing(params, text, image):
    """Runs the dynamic-interaction layers; returns pairs_emb_lst and the path pieces
    (paths_l0, mid paths..., paths_l2), each reshaped to (n_img, n_stc, -1)."""
    mid_paths = []
    pairs_emb_lst, paths_l0 = dynamic_itr_l0(params, text, image)
    for lp in params["l1"]:
        pairs_emb_lst, p1 = dynamic_itr_layer(lp["Wc"], lp["Wr"], pairs_emb_lst, NUM_CELLS)
        mid_paths.append(p1)
    pairs_emb_lst, paths_l2 = dynamic_itr_layer(params["l2_Wc"], params["l2_Wr"], pairs_emb_lst, 1)

    n_img, n_stc = paths_l2.shape[:2]
    pieces = [paths_l0.reshape(n_img, n_stc, -1)]
    pieces += [m.reshape(n_img, n_stc, -1) for m in mid_paths]
    pieces += [paths_l2.reshape(n_img, n_stc, -1)]
    return pairs_emb_lst, pieces


def interaction_module_forward(params, text, image):
    """Matches torch InteractionModule.forward: returns (pairs_emb_lst, sim_paths)."""
    pairs_emb_lst, pieces = interaction_module_routing(params, text, image)
    sim_paths = compute_sim_paths(pieces)   # fused Pallas kernel (partial-Gram accumulation)
    return pairs_emb_lst, sim_paths


if __name__ == "__main__":
    key = jax.random.PRNGKey(0)
    k_p, k_t, k_v, k_big = jax.random.split(key, 4)

    n_img, n_stc, L_t, R_img = 2, 8, 6, 5
    text = jax.random.normal(k_t, (n_stc, L_t, EMBED_SIZE), jnp.float32)
    image = jax.random.normal(k_v, (n_img, R_img, EMBED_SIZE), jnp.float32)
    params = init_params(k_p)

    # --- full forward (torch semantics) -------------------------------------------------
    pairs_emb_lst, sim_paths = interaction_module_forward(params, text, image)
    sim_paths = jax.block_until_ready(sim_paths)

    # reference: concat + matmul in plain JAX (small / f32 VPU path -> tight tolerance)
    _, pieces = interaction_module_routing(params, text, image)
    paths_ref = jnp.concatenate(pieces, axis=-1)
    ref = jnp.matmul(paths_ref, jnp.swapaxes(paths_ref, -1, -2))
    assert sim_paths.shape == (n_img, n_stc, n_stc)
    assert paths_ref.shape == (n_img, n_stc, NUM_CELLS ** 2 * (NUM_LAYER_ROUTING - 1) + NUM_CELLS)
    assert jnp.allclose(sim_paths, ref, atol=1e-5, rtol=1e-5)

    # --- exercise the scaled (tiled MXU, bf16, lane-dense) path --------------------------
    S_big = 384
    kb0, kb1, kb2 = jax.random.split(k_big, 3)
    big_pieces = [
        jax.nn.softmax(jax.random.normal(kb0, (n_img, S_big, 16), jnp.float32), axis=-1),
        jax.nn.softmax(jax.random.normal(kb1, (n_img, S_big, 16), jnp.float32), axis=-1),
        jax.nn.softmax(jax.random.normal(kb2, (n_img, S_big, 4), jnp.float32), axis=-1),
    ]
    sim_big = jax.block_until_ready(compute_sim_paths(big_pieces))
    big_cat = jnp.concatenate(big_pieces, axis=-1)
    ref_big = jnp.matmul(big_cat, jnp.swapaxes(big_cat, -1, -2))
    assert sim_big.shape == (n_img, S_big, S_big)
    # bf16 inputs on the MXU path -> looser tolerance
    assert jnp.allclose(sim_big, ref_big, atol=3e-2, rtol=3e-2)

    print("KERNEL_OK")
</pallas_src>

<mosaic_0001>
module attributes {stable_mosaic.version = 11 : i64} {
  func.func @_fused_gram_small_kernel(%arg0: i32, %arg1: memref<2x8x16xf32, #tpu.memory_space<vmem>>, %arg2: memref<2x8x16xf32, #tpu.memory_space<vmem>>, %arg3: memref<2x8x4xf32, #tpu.memory_space<vmem>>, %arg4: memref<2x8x8xf32, #tpu.memory_space<vmem>>) attributes {dimension_semantics = [#tpu.dimension_semantics<arbitrary>], iteration_bounds = array<i64: 1>, scalar_prefetch = 0 : i64, scratch_operands = 0 : i64, tpu.core_type = #tpu.core_type<tc>, window_params = [{pipeline_mode = #tpu.pipeline_mode<synchronous>, transform_indices = @transform_0, window_bounds = array<i64: 2, 8, 16>}, {pipeline_mode = #tpu.pipeline_mode<synchronous>, transform_indices = @transform_1, window_bounds = array<i64: 2, 8, 16>}, {pipeline_mode = #tpu.pipeline_mode<synchronous>, transform_indices = @transform_2, window_bounds = array<i64: 2, 8, 4>}, {pipeline_mode = #tpu.pipeline_mode<synchronous>, transform_indices = @transform_3, window_bounds = array<i64: 2, 8, 8>}]} {
    %c0 = arith.constant 0 : index
    %c0_0 = arith.constant 0 : index
    %c0_1 = arith.constant 0 : index
    %0 = vector.load %arg1[%c0, %c0_0, %c0_1] : memref<2x8x16xf32, #tpu.memory_space<vmem>>, vector<1x8x16xf32>
    %1 = vector.shape_cast %0 : vector<1x8x16xf32> to vector<8x16xf32>
    %2 = vector.shape_cast %1 : vector<8x16xf32> to vector<8x1x16xf32>
    %3 = vector.shape_cast %1 : vector<8x16xf32> to vector<1x8x16xf32>
    %4 = vector.broadcast %2 : vector<8x1x16xf32> to vector<8x8x16xf32>
    %5 = vector.broadcast %3 : vector<1x8x16xf32> to vector<8x8x16xf32>
    %6 = arith.mulf %4, %5 : vector<8x8x16xf32>
    %cst = arith.constant dense<0.000000e+00> : vector<8x8xf32>
    %7 = vector.multi_reduction <add>, %6, %cst [2] : vector<8x8x16xf32> to vector<8x8xf32>
    %c0_2 = arith.constant 0 : index
    %c0_3 = arith.constant 0 : index
    %c0_4 = arith.constant 0 : index
    %8 = vector.load %arg2[%c0_2, %c0_3, %c0_4] : memref<2x8x16xf32, #tpu.memory_space<vmem>>, vector<1x8x16xf32>
    %9 = vector.shape_cast %8 : vector<1x8x16xf32> to vector<8x16xf32>
    %10 = vector.shape_cast %9 : vector<8x16xf32> to vector<8x1x16xf32>
    %11 = vector.shape_cast %9 : vector<8x16xf32> to vector<1x8x16xf32>
    %12 = vector.broadcast %10 : vector<8x1x16xf32> to vector<8x8x16xf32>
    %13 = vector.broadcast %11 : vector<1x8x16xf32> to vector<8x8x16xf32>
    %14 = arith.mulf %12, %13 : vector<8x8x16xf32>
    %cst_5 = arith.constant dense<0.000000e+00> : vector<8x8xf32>
    %15 = vector.multi_reduction <add>, %14, %cst_5 [2] : vector<8x8x16xf32> to vector<8x8xf32>
    %16 = arith.addf %7, %15 : vector<8x8xf32>
    %c0_6 = arith.constant 0 : index
    %c0_7 = arith.constant 0 : index
    %c0_8 = arith.constant 0 : index
    %17 = vector.load %arg3[%c0_6, %c0_7, %c0_8] : memref<2x8x4xf32, #tpu.memory_space<vmem>>, vector<1x8x4xf32>
    %18 = vector.shape_cast %17 : vector<1x8x4xf32> to vector<8x4xf32>
    %19 = vector.shape_cast %18 : vector<8x4xf32> to vector<8x1x4xf32>
    %20 = vector.shape_cast %18 : vector<8x4xf32> to vector<1x8x4xf32>
    %21 = vector.broadcast %19 : vector<8x1x4xf32> to vector<8x8x4xf32>
    %22 = vector.broadcast %20 : vector<1x8x4xf32> to vector<8x8x4xf32>
    %23 = arith.mulf %21, %22 : vector<8x8x4xf32>
    %cst_9 = arith.constant dense<0.000000e+00> : vector<8x8xf32>
    %24 = vector.multi_reduction <add>, %23, %cst_9 [2] : vector<8x8x4xf32> to vector<8x8xf32>
    %25 = arith.addf %16, %24 : vector<8x8xf32>
    %c0_10 = arith.constant 0 : index
    %c0_11 = arith.constant 0 : index
    %c0_12 = arith.constant 0 : index
    %26 = vector.load %arg4[%c0_10, %c0_11, %c0_12] : memref<2x8x8xf32, #tpu.memory_space<vmem>>, vector<1x8x8xf32>
    %27 = vector.shape_cast %26 : vector<1x8x8xf32> to vector<8x8xf32>
    %28 = vector.shape_cast %25 : vector<8x8xf32> to vector<1x8x8xf32>
    tpu.vector_store %arg4[%c0_10, %c0_11, %c0_12], %28 {strides = array<i32>} : memref<2x8x8xf32, #tpu.memory_space<vmem>>, vector<1x8x8xf32>,
    %c1 = arith.constant 1 : index
    %c0_13 = arith.constant 0 : index
    %c0_14 = arith.constant 0 : index
    %29 = vector.load %arg1[%c1, %c0_13, %c0_14] : memref<2x8x16xf32, #tpu.memory_space<vmem>>, vector<1x8x16xf32>
    %30 = vector.shape_cast %29 : vector<1x8x16xf32> to vector<8x16xf32>
    %31 = vector.shape_cast %30 : vector<8x16xf32> to vector<8x1x16xf32>
    %32 = vector.shape_cast %30 : vector<8x16xf32> to vector<1x8x16xf32>
    %33 = vector.broadcast %31 : vector<8x1x16xf32> to vector<8x8x16xf32>
    %34 = vector.broadcast %32 : vector<1x8x16xf32> to vector<8x8x16xf32>
    %35 = arith.mulf %33, %34 : vector<8x8x16xf32>
    %cst_15 = arith.constant dense<0.000000e+00> : vector<8x8xf32>
    %36 = vector.multi_reduction <add>, %35, %cst_15 [2] : vector<8x8x16xf32> to vector<8x8xf32>
    %c1_16 = arith.constant 1 : index
    %c0_17 = arith.constant 0 : index
    %c0_18 = arith.constant 0 : index
    %37 = vector.load %arg2[%c1_16, %c0_17, %c0_18] : memref<2x8x16xf32, #tpu.memory_space<vmem>>, vector<1x8x16xf32>
    %38 = vector.shape_cast %37 : vector<1x8x16xf32> to vector<8x16xf32>
    %39 = vector.shape_cast %38 : vector<8x16xf32> to vector<8x1x16xf32>
    %40 = vector.shape_cast %38 : vector<8x16xf32> to vector<1x8x16xf32>
    %41 = vector.broadcast %39 : vector<8x1x16xf32> to vector<8x8x16xf32>
    %42 = vector.broadcast %40 : vector<1x8x16xf32> to vector<8x8x16xf32>
    %43 = arith.mulf %41, %42 : vector<8x8x16xf32>
    %cst_19 = arith.constant dense<0.000000e+00> : vector<8x8xf32>
    %44 = vector.multi_reduction <add>, %43, %cst_19 [2] : vector<8x8x16xf32> to vector<8x8xf32>
    %45 = arith.addf %36, %44 : vector<8x8xf32>
    %c1_20 = arith.constant 1 : index
    %c0_21 = arith.constant 0 : index
    %c0_22 = arith.constant 0 : index
    %46 = vector.load %arg3[%c1_20, %c0_21, %c0_22] : memref<2x8x4xf32, #tpu.memory_space<vmem>>, vector<1x8x4xf32>
    %47 = vector.shape_cast %46 : vector<1x8x4xf32> to vector<8x4xf32>
    %48 = vector.shape_cast %47 : vector<8x4xf32> to vector<8x1x4xf32>
    %49 = vector.shape_cast %47 : vector<8x4xf32> to vector<1x8x4xf32>
    %50 = vector.broadcast %48 : vector<8x1x4xf32> to vector<8x8x4xf32>
    %51 = vector.broadcast %49 : vector<1x8x4xf32> to vector<8x8x4xf32>
    %52 = arith.mulf %50, %51 : vector<8x8x4xf32>
    %cst_23 = arith.constant dense<0.000000e+00> : vector<8x8xf32>
    %53 = vector.multi_reduction <add>, %52, %cst_23 [2] : vector<8x8x4xf32> to vector<8x8xf32>
    %54 = arith.addf %45, %53 : vector<8x8xf32>
    %c1_24 = arith.constant 1 : index
    %c0_25 = arith.constant 0 : index
    %c0_26 = arith.constant 0 : index
    %55 = vector.load %arg4[%c1_24, %c0_25, %c0_26] : memref<2x8x8xf32, #tpu.memory_space<vmem>>, vector<1x8x8xf32>
    %56 = vector.shape_cast %55 : vector<1x8x8xf32> to vector<8x8xf32>
    %57 = vector.shape_cast %54 : vector<8x8xf32> to vector<1x8x8xf32>
    tpu.vector_store %arg4[%c1_24, %c0_25, %c0_26], %57 {strides = array<i32>} : memref<2x8x8xf32, #tpu.memory_space<vmem>>, vector<1x8x8xf32>,
    return
  }
  func.func @transform_0(%arg0: i32) -> (i32, i32, i32) {
    %c0_i32 = arith.constant 0 : i32
    %c0_i32_0 = arith.constant 0 : i32
    %c0_i32_1 = arith.constant 0 : i32
    %c0_i32_2 = arith.constant 0 : i32
    return %c0_i32, %c0_i32_0, %c0_i32_1 : i32, i32, i32
  }
  func.func @transform_1(%arg0: i32) -> (i32, i32, i32) {
    %c0_i32 = arith.constant 0 : i32
    %c0_i32_0 = arith.constant 0 : i32
    %c0_i32_1 = arith.constant 0 : i32
    %c0_i32_2 = arith.constant 0 : i32
    return %c0_i32, %c0_i32_0, %c0_i32_1 : i32, i32, i32
  }
  func.func @transform_2(%arg0: i32) -> (i32, i32, i32) {
    %c0_i32 = arith.constant 0 : i32
    %c0_i32_0 = arith.constant 0 : i32
    %c0_i32_1 = arith.constant 0 : i32
    %c0_i32_2 = arith.constant 0 : i32
    return %c0_i32, %c0_i32_0, %c0_i32_1 : i32, i32, i32
  }
  func.func @transform_3(%arg0: i32) -> (i32, i32, i32) {
    %c0_i32 = arith.constant 0 : i32
    %c0_i32_0 = arith.constant 0 : i32
    %c0_i32_1 = arith.constant 0 : i32
    %c0_i32_2 = arith.constant 0 : i32
    return %c0_i32, %c0_i32_0, %c0_i32_1 : i32, i32, i32
  }
}

</mosaic_0001>

<bundles_post_ra>
// kernel: tpu_custom_call.1
= control target key start
LH: loop header
LB: loop body
LE: loop exit
PB: predicated region body
PF: predicated region fallthrough
CT: control target
= control target key end

     0   :  { %8 = vsyncpa [#allocation3], 0  ;;  %s1402_s0 = inlined_call_operand.vmem [shape: f32[2,8,16], index: 0, kind: input, shape index: {}]   ;;  %s1403_s1 = inlined_call_operand.hbm [shape: f32[2,8,16], index: 1, kind: input, shape index: {}]   ;;  %s1404_s2 = inlined_call_operand.vmem [shape: f32[2,8,4], index: 2, kind: input, shape index: {}]   ;;  %s1405_s3 = inlined_call_operand.hbm [shape: f32[2,8,8], index: 3, kind: output, shape index: {}]  }
   0x1   :  { %9 = vsyncpa [#allocation4], 0  ;;  %s991_s12 = smov [#allocation2]   ;;  %s943_s16 = scalar_lea.hbm %s1403_s1, 256 }
   0x2   :  { %s17_s13 = sshll.u32 %s991_s12, 4  ;;  %p944_p0 = scmp.ne.s32.totalorder %s1403_s1, %s943_s16  ;;  %s18_s13 = int_to_ptr.vmem [resolvable:$true] %s17_s13 }
   0x3   :  { %p947_p1 = scmp.lt.u32.totalorder %s943_s16, %s1403_s1 }
   0x5   :  { %p949_p2 = pnand %p947_p1, %p944_p0 }
   0x7   :  { %952 = shalt.err (!%p949_p2)
}
   0x8   :  { %s953_s21 = scalar_lea.vmem %s18_s13, 256  ;;  %p958_p4 = scmp.lt.s32.totalorder %s18_s13, %s18_s13 }
   0x9   :  { %p954_p3 = scmp.ne.s32.totalorder %s18_s13, %s953_s21  ;;  %p959_p5 = scmp.lt.s32.totalorder %s953_s21, %s953_s21 }
   0xb   :  { %p960_p6 = por %p959_p5, %p958_p4 }
   0xd   :  { %p961_p7 = pnand %p960_p6, %p954_p3 }
   0xf   :  { %964 = shalt.err (!%p961_p7)
}
  0x10   :  { %s992_s22 = smov 128   ;;  %s993_s23 = smov 8  }
  0x11   :  { %23 = dma.hbm_to_vmem [thread:$0]  %s1403_s1, 256, %s18_s13, [#allocation3], %s992_s22, %s992_s22, %s993_s23  }
  0x12   :  { %987 = dma.done.wait [#allocation3], 256  }
  0x13   :  { %988 = vsyncadd [#allocation3], 4294967040  ;;  %v35_v0 = vlaneseq  ;;  %v994_v1 = vmov 1966171168   ;;  %v1040_v7 = vld [vmem:[#allocation2] sm:$0xff]  ;;  %v1050_v9 = vld [vmem:[%s1402_s0 + $0x8] sm:$0xff] }
  0x14   :  { %v33_v2 = vunpack.c.l.s4 %v994_v1  ;;  %v1045_v8 = vld [vmem:[%s1402_s0] sm:$0xff]  ;;  %v1058_v13 = vld [vmem:[#allocation2 + $0x8] sm:$0xff]  ;;  %vm128_vm0 = vcmask 130048   ;;  %vm383_vm1 = vcmask 31744   ;;  %vm458_vm2 = vcmask 1041409  }
  0x15   :  { %v1032_v3 = vshrl.u32 %v35_v0, 7  ;;  %v31_v14 = vcombine.high %v1045_v8, %v1045_v8  ;;  %v1106_v50 = vld [vmem:[%s1404_s2] sm:$0xff]  ;;  %v1114_v54 = vld [vmem:[%s1404_s2 + $0x8] sm:$0xff]  ;;  %vm460_vm3 = vcmask 1042434   ;;  %vm462_vm4 = vcmask 1043459   ;;  %s995_s2 = smov [#allocation5]  }
  0x16   :  { %v34_v4 = vunpack.c.0.s8 %v33_v2  ;;  %vm464_vm5 = vcmask 1044484   ;;  %vm466_vm6 = vcmask 1045509   ;;  %vm468_vm7 = vcmask 1046534   ;;  %s918_s5 = sshll.u32 %s995_s2, 4  ;;  %s919_s5 = int_to_ptr.vmem [resolvable:$true] %s918_s5 }
  0x17   :  { %v1038_v6 = vsub.s32 0, %v1032_v3  ;;  %vm470_vm8 = vcmask 1047559   ;;  %vm473_vm9 = vcmask 64512   ;;  %s965_s6 = scalar_lea.vmem %s919_s5, 256  ;;  %p970_p9 = scmp.lt.s32.totalorder %s919_s5, %s919_s5 }
  0x18   :  { %v1035_v5 = vsub.s32 %v34_v4, %v1032_v3  ;;  %v155_v4 = vcombine.high %v1040_v7, %v1040_v7  ;;  %p966_p8 = scmp.ne.s32.totalorder %s919_s5, %s965_s6  ;;  %p971_p10 = scmp.lt.s32.totalorder %s965_s6, %s965_s6 }
  0x1a   :  { %v162_v10 = vrot.slane %v1040_v7, %v1035_v5  ;;  %v38_v11 = vrot.slane %v1045_v8, %v1035_v5  ;;  %v485_v12 = vrot.slane %v1050_v9, %v1035_v5  ;;  %v609_v15 = vrot.slane %v1058_v13, %v1035_v5  ;;  %p972_p11 = por %p971_p10, %p970_p9 }
  0x1b   :  { %v1071_v21 = vrot.slane %v31_v14, %v1035_v5  ;;  %v293_v59 = vrot.slane %v1106_v50, %v1035_v5  ;;  %v741_v63 = vrot.slane %v1114_v54, %v1035_v5 }
  0x1c   :  { %v178_v16 = vrot.slane %v162_v10, %v1035_v5  ;;  %v54_v17 = vrot.slane %v38_v11, %v1035_v5  ;;  %v1067_v18 = vrot.slane %v485_v12, %v1035_v5  ;;  %v46_v19 = vcombine.high %v38_v11, %v38_v11  ;;  %p973_p12 = pnand %p972_p11, %p966_p8 }
  0x1d   :  { %v625_v20 = vrot.slane %v609_v15, %v1035_v5  ;;  %v170_v22 = vcombine.high %v162_v10, %v162_v10  ;;  %v493_v23 = vcombine.high %v485_v12, %v485_v12  ;;  %v1081_v29 = vrot.slane %v1071_v21, %v1035_v5 }
  0x1e   :  { %v207_v24 = vrot.slane %v178_v16, %v1038_v6  ;;  %v83_v25 = vrot.slane %v54_v17, %v1038_v6  ;;  %v530_v26 = vrot.slane %v1067_v18, %v1038_v6  ;;  %v68_v27 = vrot.slane %v46_v19, %v1035_v5 }
  0x1f   :  { %v654_v28 = vrot.slane %v625_v20, %v1038_v6  ;;  %v76_v30 = vcombine.high %v54_v17, %v54_v17  ;;  %v1084_v31 = vrot.slane %v170_v22, %v1035_v5  ;;  %v99_v36 = vrot.slane %v1081_v29, %v1038_v6 }
  0x20   :  { %v244_v32 = vmul.f32 %v207_v24, %v1040_v7  ;;  %v120_v33 = vmul.f32 %v83_v25, %v1045_v8  ;;  %v567_v34 = vmul.f32 %v1050_v9, %v530_v26  ;;  %v87_v35 = vrot.slane %v68_v27, %v1038_v6 }
  0x21   :  { %v691_v41 = vmul.f32 %v654_v28, %v1058_v13  ;;  %v91_v42 = vrot.slane %v76_v30, %v1038_v6  ;;  %v211_v43 = vrot.slane %v1084_v31, %v1038_v6  ;;  %v124_v45 = vmul.f32 %v99_v36, %v1045_v8 }
  0x22   :  { %v252_v37 = vsel %vm128_vm0, %v244_v32, 0.0  ;;  %v129_v38 = vsel %vm128_vm0, %v120_v33, 0.0  ;;  %v121_v39 = vmul.f32 %v87_v35, %v1045_v8  ;;  %v575_v40 = vsel %vm128_vm0, %v567_v34, 0.0 }
  0x23   :  { %253 = vadd.xlane.f32.xlu1 %v252_v37  ;;  %130 = vadd.xlane.f32.xlu0 %v129_v38  ;;  %v200_v46 = vcombine.high %v178_v16, %v178_v16  ;;  %v515_v47 = vrot.slane %v493_v23, %v1035_v5  ;;  %v617_v48 = vcombine.high %v609_v15, %v609_v15  ;;  %v699_v51 = vsel %vm128_vm0, %v691_v41, 0.0 }
  0x24   :  { %v132_v44 = vsel %vm128_vm0, %v121_v39, 0.0  ;;  %v78_v49 = vcombine.high %v68_v27, %v68_v27  ;;  %v141_v55 = vsel %vm128_vm0, %v124_v45, 0.0  ;;  %v122_v56 = vmul.f32 %v91_v42, %v1045_v8 }
  0x25   :  { %v215_v52 = vrot.slane %v200_v46, %v1038_v6  ;;  %v534_v53 = vrot.slane %v515_v47, %v1038_v6  ;;  %v245_v57 = vmul.f32 %v211_v43, %v1040_v7  ;;  %v639_v58 = vrot.slane %v617_v48, %v1035_v5 }
  0x26   :  { %v95_v60 = vrot.slane %v78_v49, %v1038_v6  ;;  %v647_v61 = vcombine.high %v625_v20, %v625_v20  ;;  %v523_v62 = vcombine.high %v1067_v18, %v1067_v18  ;;  %v135_v10 = vsel %vm128_vm0, %v122_v56, 0.0 }
  0x27   :  { %576 = vadd.xlane.f32.xlu1 %v575_v40  ;;  %133 = vadd.xlane.f32.xlu0 %v132_v44  ;;  %v246_v1 = vmul.f32 %v215_v52, %v1040_v7  ;;  %v568_v2 = vmul.f32 %v1050_v9, %v534_v53  ;;  %v255_v11 = vsel %vm128_vm0, %v245_v57, 0.0  ;;  %v658_v12 = vrot.slane %v639_v58, %v1038_v6 }
  0x28   :  { %v301_v14 = vcombine.high %v293_v59, %v293_v59  ;;  %v309_v15 = vrot.slane %v293_v59, %v1035_v5  ;;  %v123_v16 = vmul.f32 %v95_v60, %v1045_v8  ;;  %v662_v17 = vrot.slane %v647_v61, %v1038_v6 }
  0x29   :  { %v538_v18 = vrot.slane %v523_v62, %v1038_v6  ;;  %v202_v19 = vcombine.high %v1084_v31, %v1084_v31  ;;  %v258_v20 = vsel %vm128_vm0, %v246_v1, 0.0  ;;  %v578_v22 = vsel %vm128_vm0, %v568_v2, 0.0 }
  0x2a   :  { %v169_v23 = vrot.slane %v155_v4, %v1035_v5  ;;  %v749_v24 = vcombine.high %v741_v63, %v741_v63  ;;  %v692_v25 = vmul.f32 %v658_v12, %v1058_v13  ;;  %v525_v26 = vcombine.high %v515_v47, %v515_v47 }
  0x2b   :  { %700 = vadd.xlane.f32.xlu1 %v699_v51  ;;  %142 = vadd.xlane.f32.xlu0 %v141_v55  ;;  %v1145_v27 = vrot.slane %v301_v14, %v1035_v5  ;;  %v757_v28 = vrot.slane %v741_v63, %v1035_v5  ;;  %v338_v30 = vrot.slane %v309_v15, %v1038_v6  ;;  %v138_v36 = vsel %vm128_vm0, %v123_v16, 0.0 }
  0x2c   :  { %v649_v31 = vcombine.high %v639_v58, %v639_v58  ;;  %v478_v32 = vcombine.high %v1050_v9, %v1050_v9  ;;  %v693_v33 = vmul.f32 %v662_v17, %v1058_v13  ;;  %v569_v34 = vmul.f32 %v1050_v9, %v538_v18 }
  0x2d   :  { %v185_v35 = vrot.slane %v169_v23, %v1035_v5  ;;  %v219_v37 = vrot.slane %v202_v19, %v1038_v6  ;;  %v1157_v38 = vrot.slane %v749_v24, %v1035_v5  ;;  %v702_v40 = vsel %vm128_vm0, %v692_v25, 0.0 }
  0x2e   :  { %v492_v39 = vrot.slane %v478_v32, %v1035_v5  ;;  %v542_v41 = vrot.slane %v525_v26, %v1038_v6  ;;  %v342_v42 = vrot.slane %v1145_v27, %v1038_v6  ;;  %v786_v43 = vrot.slane %v757_v28, %v1038_v6 }
  0x2f   :  { %136 = vadd.xlane.f32.xlu1 %v135_v10  ;;  %256 = vadd.xlane.f32.xlu0 %v255_v11  ;;  %v375_v44 = vmul.f32 %v338_v30, %v1106_v50  ;;  %v666_v45 = vrot.slane %v649_v31, %v1038_v6  ;;  %v331_v46 = vcombine.high %v309_v15, %v309_v15  ;;  %v705_v48 = vsel %vm128_vm0, %v693_v33, 0.0 }
  0x30   :  { %v602_v47 = vcombine.high %v1058_v13, %v1058_v13  ;;  %v223_v49 = vrot.slane %v185_v35, %v1038_v6  ;;  %v508_v51 = vrot.slane %v492_v39, %v1035_v5  ;;  %v779_v52 = vcombine.high %v757_v28, %v757_v28 }
  0x31   :  { %v581_v53 = vsel %vm128_vm0, %v569_v34, 0.0  ;;  %v247_v55 = vmul.f32 %v219_v37, %v1040_v7  ;;  %v790_v56 = vrot.slane %v1157_v38, %v1038_v6  ;;  %v171_v57 = vcombine.high %v169_v23, %v169_v23 }
  0x32   :  { %v570_v58 = vmul.f32 %v1050_v9, %v542_v41  ;;  %v376_v59 = vmul.f32 %v342_v42, %v1106_v50  ;;  %v823_v60 = vmul.f32 %v1114_v54, %v786_v43  ;;  %v47_v61 = vcombine.high %v1071_v21, %v1071_v21 }
  0x33   :  { %259 = vadd.xlane.f32.xlu1 %v258_v20  ;;  %579 = vadd.xlane.f32.xlu0 %v578_v22  ;;  %v694_v62 = vmul.f32 %v666_v45, %v1058_v13  ;;  %v346_v63 = vrot.slane %v331_v46, %v1038_v6  ;;  %v616_v1 = vrot.slane %v602_v47, %v1035_v5  ;;  %v384_v11 = vsel %vm383_vm1, %v375_v44, 0.0 }
  0x34   :  { %v248_v2 = vmul.f32 %v223_v49, %v1040_v7  ;;  %v546_v4 = vrot.slane %v508_v51, %v1038_v6  ;;  %v794_v10 = vrot.slane %v779_v52, %v1038_v6  ;;  %v261_v12 = vsel %vm128_vm0, %v247_v55, 0.0 }
  0x35   :  { %v824_v21 = vmul.f32 %v1114_v54, %v790_v56  ;;  %v1191_v14 = vrot.slane %v171_v57, %v1035_v5  ;;  %v584_v15 = vsel %vm128_vm0, %v570_v58, 0.0  ;;  %v387_v16 = vsel %vm383_vm1, %v376_v59, 0.0 }
  0x36   :  { %v831_v17 = vsel %vm383_vm1, %v823_v60, 0.0  ;;  %v1197_v18 = vrot.slane %v47_v61, %v1035_v5  ;;  %v708_v19 = vsel %vm128_vm0, %v694_v62, 0.0  ;;  %v377_v20 = vmul.f32 %v346_v63, %v1106_v50 }
  0x37   :  { %139 = vadd.xlane.f32.xlu1 %v138_v36  ;;  %703 = vadd.xlane.f32.xlu0 %v702_v40  ;;  %v1202_v22 = vrot.slane %v616_v1, %v1035_v5  ;;  %v201_v23 = vcombine.high %v185_v35, %v185_v35  ;;  %v264_v24 = vsel %vm128_vm0, %v248_v2, 0.0  ;;  %v571_v25 = vmul.f32 %v1050_v9, %v546_v4 }
  0x38   :  { %v1207_v26 = vmul.f32 %v1114_v54, %v794_v10  ;;  %v494_v28 = vcombine.high %v492_v39, %v492_v39  ;;  %v834_v30 = vsel %vm383_vm1, %v824_v21, 0.0  ;;  %v227_v31 = vrot.slane %v1191_v14, %v1038_v6 }
  0x39   :  { %v333_v32 = vcombine.high %v1145_v27, %v1145_v27  ;;  %v231_v33 = vrot.slane %v201_v23, %v1038_v6  ;;  %v103_v34 = vrot.slane %v1197_v18, %v1038_v6  ;;  %v618_v35 = vcombine.high %v616_v1, %v616_v1 }
  0x3a   :  { %v77_v36 = vcombine.high %v1081_v29, %v1081_v29  ;;  %v524_v37 = vcombine.high %v508_v51, %v508_v51  ;;  %v670_v39 = vrot.slane %v1202_v22, %v1038_v6  ;;  %v286_v41 = vcombine.high %v1106_v50, %v1106_v50 }
  0x3b   :  { %706 = vadd.xlane.f32.xlu1 %v705_v48  ;;  %582 = vadd.xlane.f32.xlu0 %v581_v53  ;;  %v250_v40 = vmul.f32 %v231_v33, %v1040_v7  ;;  %v734_v27 = vcombine.high %v1114_v54, %v1114_v54  ;;  %v1227_v42 = vrot.slane %v494_v28, %v1035_v5  ;;  %v390_v63 = vsel %vm383_vm1, %v377_v20, 0.0 }
  0x3c   :  { %v107_v43 = vrot.slane %v77_v36, %v1038_v6  ;;  %v554_v44 = vrot.slane %v524_v37, %v1038_v6  ;;  %v648_v29 = vcombine.high %v1202_v22, %v1202_v22  ;;  %v300_v46 = vrot.slane %v286_v41, %v1035_v5 }
  0x3d   :  { %v1234_v45 = vsel %vm128_vm0, %v250_v40, 0.0  ;;  %v748_v47 = vrot.slane %v734_v27, %v1035_v5  ;;  %v203_v48 = vcombine.high %v1191_v14, %v1191_v14  ;;  %v1241_v49 = vrot.slane %v618_v35, %v1035_v5 }
  0x3e   :  { %v126_v51 = vmul.f32 %v107_v43, %v1045_v8  ;;  %v573_v52 = vmul.f32 %v1050_v9, %v554_v44  ;;  %v678_v53 = vrot.slane %v648_v29, %v1038_v6  ;;  %v1247_v55 = vrot.slane %v300_v46, %v1035_v5 }
  0x3f   :  { %385 = vadd.xlane.f32.xlu1 %v384_v11  ;;  %262 = vadd.xlane.f32.xlu0 %v261_v12  ;;  %v1250_v56 = vrot.slane %v748_v47, %v1035_v5  ;;  %v235_v57 = vrot.slane %v203_v48, %v1038_v6  ;;  %v79_v58 = vcombine.high %v1197_v18, %v1197_v18  ;;  %v425_v44 = vand.u32 127, %v35_v0 }
  0x40   :  { %v1256_v59 = vsel %vm128_vm0, %v126_v51, 0.0  ;;  %v1259_v60 = vsel %vm128_vm0, %v573_v52, 0.0  ;;  %v697_v61 = vmul.f32 %v678_v53, %v1058_v13  ;;  %v526_v62 = vcombine.high %v1227_v42, %v1227_v42 }
  0x41   :  { %v354_v1 = vrot.slane %v1247_v55, %v1038_v6  ;;  %v802_v2 = vrot.slane %v1250_v56, %v1038_v6  ;;  %v251_v4 = vmul.f32 %v235_v57, %v1040_v7  ;;  %v111_v11 = vrot.slane %v79_v58, %v1038_v6 }
  0x42   :  { %v1271_v10 = vsel %vm128_vm0, %v697_v61, 0.0  ;;  %v558_v12 = vrot.slane %v526_v62, %v1038_v6  ;;  %v302_v21 = vcombine.high %v300_v46, %v300_v46  ;;  %v650_v28 = vcombine.high %v1241_v49, %v1241_v49 }
  0x43   :  { %585 = vadd.xlane.f32.xlu1 %v584_v15  ;;  %388 = vadd.xlane.f32.xlu0 %v387_v16  ;;  %v350_v15 = vrot.slane %v333_v32, %v1038_v6  ;;  %v781_v16 = vcombine.high %v1157_v38, %v1157_v38  ;;  %v127_v20 = vmul.f32 %v111_v11, %v1045_v8  ;;  %v587_v32 = vsel %vm128_vm0, %v571_v25, 0.0 }
  0x44   :  { %v574_v22 = vmul.f32 %v1050_v9, %v558_v12  ;;  %v1284_v23 = vrot.slane %v302_v21, %v1035_v5  ;;  %v695_v38 = vmul.f32 %v670_v39, %v1058_v13  ;;  %v780_v35 = vcombine.high %v1250_v56, %v1250_v56 }
  0x45   :  { %v150_v36 = vsel %vm128_vm0, %v127_v20, 0.0  ;;  %v249_v41 = vmul.f32 %v227_v31, %v1040_v7  ;;  %v837_v29 = vsel %vm383_vm1, %v1207_v26, 0.0  ;;  %v125_v46 = vmul.f32 %v103_v34, %v1045_v8 }
  0x46   :  { %v596_v37 = vsel %vm128_vm0, %v574_v22, 0.0  ;;  %v358_v40 = vrot.slane %v1284_v23, %v1038_v6  ;;  %v334_v43 = vcombine.high %v1284_v23, %v1284_v23  ;;  %v550_v7 = vrot.slane %v1227_v42, %v1038_v6 }
  0x47   :  { %832 = vadd.xlane.f32.xlu1 %v831_v17  ;;  %709 = vadd.xlane.f32.xlu0 %v708_v19  ;;  %v1279_v17 = vsel %vm128_vm0, %v251_v4, 0.0  ;;  %v750_v19 = vcombine.high %v748_v47, %v748_v47  ;;  %v711_v31 = vsel %vm128_vm0, %v695_v38, 0.0  ;;  %v1330_v51 = vsub.s32 %v425_v44, %v1032_v3 }
  0x48   :  { %v366_v48 = vrot.slane %v334_v43, %v1038_v6  ;;  %v267_v34 = vsel %vm128_vm0, %v249_v41, 0.0  ;;  %v144_v42 = vsel %vm128_vm0, %v125_v46, 0.0  ;;  %v378_v52 = vmul.f32 %v350_v15, %v1106_v50 }
  0x49   :  { %v1291_v33 = vrot.slane %v750_v19, %v1035_v5  ;;  %v332_v5 = vcombine.high %v1247_v55, %v1247_v55  ;;  %v798_v53 = vrot.slane %v781_v16, %v1038_v6  ;;  %v572_v57 = vmul.f32 %v1050_v9, %v550_v7 }
  0x4a   :  { %v382_v18 = vmul.f32 %v366_v48, %v1106_v50  ;;  %v674_v3 = vrot.slane %v1241_v49, %v1038_v6  ;;  %v379_v12 = vmul.f32 %v354_v1, %v1106_v50  ;;  %v380_v55 = vmul.f32 %v358_v40, %v1106_v50 }
  0x4b   :  { %265 = vadd.xlane.f32.xlu1 %v264_v24  ;;  %835 = vadd.xlane.f32.xlu0 %v834_v30  ;;  %v682_v24 = vrot.slane %v650_v28, %v1038_v6  ;;  %v806_v25 = vrot.slane %v1291_v33, %v1038_v6  ;;  %v810_v30 = vrot.slane %v780_v35, %v1038_v6  ;;  %v590_v62 = vsel %vm128_vm0, %v572_v57, 0.0 }
  0x4c   :  { %v782_v39 = vcombine.high %v1291_v33, %v1291_v33  ;;  %v362_v14 = vrot.slane %v332_v5, %v1038_v6  ;;  %v405_v61 = vsel %vm383_vm1, %v382_v18, 0.0  ;;  %v826_v4 = vmul.f32 %v1114_v54, %v798_v53 }
  0x4d   :  { %v698_v27 = vmul.f32 %v682_v24, %v1058_v13  ;;  %v696_v11 = vmul.f32 %v674_v3, %v1058_v13  ;;  %v396_v21 = vsel %vm383_vm1, %v379_v12, 0.0  ;;  %v827_v13 = vmul.f32 %v1114_v54, %v802_v2 }
  0x4e   :  { %v814_v0 = vrot.slane %v782_v39, %v1038_v6  ;;  %v381_v26 = vmul.f32 %v362_v14, %v1106_v50  ;;  %v840_v9 = vsel %vm383_vm1, %v826_v4, 0.0  ;;  %v829_v56 = vmul.f32 %v1114_v54, %v810_v30 }
  0x4f   :  { %588 = vadd.xlane.f32.xlu1 %v587_v32  ;;  %391 = vadd.xlane.f32.xlu0 %v390_v63  ;;  %v720_v47 = vsel %vm128_vm0, %v698_v27, 0.0  ;;  %v393_v63 = vsel %vm383_vm1, %v378_v52, 0.0  ;;  %v714_v49 = vsel %vm128_vm0, %v696_v11, 0.0  ;;  %v843_v15 = vsel %vm383_vm1, %v827_v13, 0.0 }
  0x50   :  { %v830_v8 = vmul.f32 %v1114_v54, %v814_v0  ;;  %v402_v1 = vsel %vm383_vm1, %v381_v26, 0.0 }
  0x52   :  { %v852_v58 = vsel %vm383_vm1, %v830_v8, 0.0 }
  0x53   :  { %838 = vadd.xlane.f32.xlu1 %v837_v29  ;;  %712 = vadd.xlane.f32.xlu0 %v711_v31 }
  0x57   :  { %268 = vadd.xlane.f32.xlu1 %v267_v34  ;;  %145 = vadd.xlane.f32.xlu0 %v144_v42 }
  0x5b   :  { %591 = vadd.xlane.f32.xlu1 %v590_v62  ;;  %394 = vadd.xlane.f32.xlu0 %v393_v63 }
  0x5f   :  { %841 = vadd.xlane.f32.xlu1 %v840_v9  ;;  %715 = vadd.xlane.f32.xlu0 %v714_v49 }
  0x63   :  { %271 = vadd.xlane.f32.xlu1 %v1234_v45  ;;  %148 = vadd.xlane.f32.xlu0 %v1256_v59  ;;  %v399_v45 = vsel %vm383_vm1, %v380_v55, 0.0  ;;  %v828_v59 = vmul.f32 %v1114_v54, %v806_v25 }
  0x65   :  { %v846_v6 = vsel %vm383_vm1, %v828_v59, 0.0 }
  0x67   :  { %594 = vadd.xlane.f32.xlu1 %v1259_v60  ;;  %397 = vadd.xlane.f32.xlu0 %v396_v21  ;;  %v849_v60 = vsel %vm383_vm1, %v829_v56, 0.0 }
  0x6b   :  { %844 = vadd.xlane.f32.xlu1 %v843_v15  ;;  %718 = vadd.xlane.f32.xlu0 %v1271_v10 }
  0x6f   :  { %274 = vadd.xlane.f32.xlu1 %v1279_v17  ;;  %151 = vadd.xlane.f32.xlu0 %v150_v36 }
  0x73   :  { %597 = vadd.xlane.f32.xlu1 %v596_v37  ;;  %400 = vadd.xlane.f32.xlu0 %v399_v45 }
  0x77   :  { %847 = vadd.xlane.f32.xlu1 %v846_v6  ;;  %721 = vadd.xlane.f32.xlu0 %v720_v47 }
  0x7b   :  { %850 = vadd.xlane.f32.xlu1 %v849_v60  ;;  %403 = vadd.xlane.f32.xlu0 %v402_v1 }
  0x7f   :  { %853 = vadd.xlane.f32.xlu1 %v852_v58  ;;  %406 = vadd.xlane.f32.xlu0 %v405_v61 }
  0xb0   :  { %v254_v50 = vpop.xlane.xlu1 %253  ;;  %v131_v2 = vpop.xlane.xlu0 %130 }
  0xb1   :  { %v276_v10 = vadd.f32 %v254_v50, %v131_v2 }
  0xb4   :  { %v577_v16 = vpop.xlane.xlu1 %576  ;;  %v134_v17 = vpop.xlane.xlu0 %133 }
  0xb8   :  { %v701_v19 = vpop.xlane.xlu1 %700  ;;  %v143_v20 = vpop.xlane.xlu0 %142 }
  0xb9   :  { %v723_v22 = vadd.f32 %v701_v19, %v577_v16 }
  0xbc   :  { %v137_v23 = vpop.xlane.xlu1 %136  ;;  %v257_v54 = vpop.xlane.xlu0 %256 }
  0xbd   :  { %v277_v28 = vadd.f32 %v257_v54, %v134_v17 }
  0xc0   :  { %v260_v32 = vpop.xlane.xlu1 %259  ;;  %v580_v38 = vpop.xlane.xlu0 %579 }
  0xc1   :  { %v278_v33 = vadd.f32 %v260_v32, %v137_v23 }
  0xc4   :  { %v140_v35 = vpop.xlane.xlu1 %139  ;;  %v704_v36 = vpop.xlane.xlu0 %703 }
  0xc5   :  { %v724_v37 = vadd.f32 %v704_v36, %v580_v38 }
  0xc8   :  { %v707_v40 = vpop.xlane.xlu1 %706  ;;  %v583_v24 = vpop.xlane.xlu0 %582 }
  0xc9   :  { %v725_v52 = vadd.f32 %v707_v40, %v583_v24 }
  0xcc   :  { %v386_v25 = vpop.xlane.xlu1 %385  ;;  %v263_v30 = vpop.xlane.xlu0 %262 }
  0xcd   :  { %v408_v5 = vadd.f32 %v386_v25, %v276_v10  ;;  %v279_v9 = vadd.f32 %v263_v30, %v140_v35 }
  0xcf   :  { %v429_v39 = vrot.slane %v408_v5, %v1330_v51 }
  0xd0   :  { %v586_v41 = vpop.xlane.xlu1 %585  ;;  %v389_v27 = vpop.xlane.xlu0 %388 }
  0xd1   :  { %v409_v43 = vadd.f32 %v389_v27, %v277_v28 }
  0xd3   :  { %v433_v44 = vrot.slane %v409_v43, %v1330_v51 }
  0xd4   :  { %v833_v29 = vpop.xlane.xlu1 %832  ;;  %v710_v46 = vpop.xlane.xlu0 %709 }
  0xd5   :  { %v459_v7 = vsel %vm458_vm2, %v433_v44, %v429_v39  ;;  %v855_v14 = vadd.f32 %v833_v29, %v723_v22  ;;  %v726_v13 = vadd.f32 %v710_v46, %v586_v41 }
  0xd7   :  { %v874_v31 = vrot.slane %v855_v14, %v1330_v51 }
  0xd8   :  { %v266_v47 = vpop.xlane.xlu1 %265  ;;  %v836_v0 = vpop.xlane.xlu0 %835 }
  0xd9   :  { %v856_v48 = vadd.f32 %v836_v0, %v724_v37  ;;  %v280_v2 = vadd.f32 %v266_v47, %v143_v20 }
  0xdb   :  { %v878_v26 = vrot.slane %v856_v48, %v1330_v51 }
  0xdc   :  { %v589_v8 = vpop.xlane.xlu1 %588  ;;  %v392_v18 = vpop.xlane.xlu0 %391 }
  0xdd   :  { %v903_v34 = vsel %vm458_vm2, %v878_v26, %v874_v31  ;;  %v410_v42 = vadd.f32 %v392_v18, %v278_v33 }
  0xdf   :  { %v437_v53 = vrot.slane %v410_v42, %v1330_v51 }
  0xe0   :  { %v839_v57 = vpop.xlane.xlu1 %838  ;;  %v713_v3 = vpop.xlane.xlu0 %712 }
  0xe1   :  { %v461_v58 = vsel %vm460_vm3, %v437_v53, %v459_v7  ;;  %v857_v61 = vadd.f32 %v839_v57, %v725_v52  ;;  %v727_v19 = vadd.f32 %v713_v3, %v589_v8 }
  0xe3   :  { %v882_v62 = vrot.slane %v857_v61, %v1330_v51 }
  0xe4   :  { %v269_v63 = vpop.xlane.xlu1 %268  ;;  %v146_v4 = vpop.xlane.xlu0 %145 }
  0xe5   :  { %v904_v11 = vsel %vm460_vm3, %v882_v62, %v903_v34  ;;  %v281_v37 = vadd.f32 %v269_v63, %v146_v4 }
  0xe8   :  { %v592_v49 = vpop.xlane.xlu1 %591  ;;  %v395_v12 = vpop.xlane.xlu0 %394 }
  0xe9   :  { %v411_v21 = vadd.f32 %v395_v12, %v279_v9 }
  0xeb   :  { %v441_v15 = vrot.slane %v411_v21, %v1330_v51 }
  0xec   :  { %v842_v55 = vpop.xlane.xlu1 %841  ;;  %v716_v45 = vpop.xlane.xlu0 %715 }
  0xed   :  { %v463_v59 = vsel %vm462_vm4, %v441_v15, %v461_v58  ;;  %v858_v6 = vadd.f32 %v842_v55, %v726_v13  ;;  %v728_v25 = vadd.f32 %v716_v45, %v592_v49 }
  0xef   :  { %v886_v56 = vrot.slane %v858_v6, %v1330_v51 }
  0xf0   :  { %v272_v60 = vpop.xlane.xlu1 %271  ;;  %v149_v1 = vpop.xlane.xlu0 %148 }
  0xf1   :  { %v905_v50 = vsel %vm462_vm4, %v886_v56, %v904_v11  ;;  %v282_v43 = vadd.f32 %v272_v60, %v149_v1 }
  0xf4   :  { %v595_v10 = vpop.xlane.xlu1 %594  ;;  %v398_v16 = vpop.xlane.xlu0 %397 }
  0xf5   :  { %v412_v17 = vadd.f32 %v398_v16, %v280_v2 }
  0xf7   :  { %v445_v22 = vrot.slane %v412_v17, %v1330_v51 }
  0xf8   :  { %v845_v23 = vpop.xlane.xlu1 %844  ;;  %v719_v54 = vpop.xlane.xlu0 %718 }
  0xf9   :  { %v465_v28 = vsel %vm464_vm5, %v445_v22, %v463_v59  ;;  %v859_v32 = vadd.f32 %v845_v23, %v727_v19  ;;  %v729_v44 = vadd.f32 %v719_v54, %v595_v10 }
  0xfb   :  { %v890_v38 = vrot.slane %v859_v32, %v1330_v51 }
  0xfc   :  { %v275_v33 = vpop.xlane.xlu1 %274  ;;  %v152_v35 = vpop.xlane.xlu0 %151 }
  0xfd   :  { %v906_v36 = vsel %vm464_vm5, %v890_v38, %v905_v50  ;;  %v283_v0 = vadd.f32 %v275_v33, %v152_v35 }
 0x100   :  { %v598_v40 = vpop.xlane.xlu1 %597  ;;  %v401_v24 = vpop.xlane.xlu0 %400 }
 0x101   :  { %v413_v20 = vadd.f32 %v401_v24, %v281_v37 }
 0x103   :  { %v449_v30 = vrot.slane %v413_v20, %v1330_v51 }
 0x104   :  { %v848_v5 = vpop.xlane.xlu1 %847  ;;  %v722_v39 = vpop.xlane.xlu0 %721 }
 0x105   :  { %v467_v41 = vsel %vm466_vm6, %v449_v30, %v465_v28  ;;  %v860_v27 = vadd.f32 %v848_v5, %v728_v25  ;;  %v730_v48 = vadd.f32 %v722_v39, %v598_v40 }
 0x107   :  { %v894_v29 = vrot.slane %v860_v27, %v1330_v51 }
 0x108   :  { %v851_v46 = vpop.xlane.xlu1 %850  ;;  %v404_v7 = vpop.xlane.xlu0 %403 }
 0x109   :  { %v907_v14 = vsel %vm466_vm6, %v894_v29, %v906_v36  ;;  %v861_v31 = vadd.f32 %v851_v46, %v729_v44  ;;  %v414_v47 = vadd.f32 %v404_v7, %v282_v43 }
 0x10b   :  { %v898_v26 = vrot.slane %v861_v31, %v1330_v51  ;;  %v453_v8 = vrot.slane %v414_v47, %v1330_v51 }
 0x10c   :  { %v854_v18 = vpop.xlane.xlu1 %853  ;;  %v407_v34 = vpop.xlane.xlu0 %406 }
 0x10d   :  { %v908_v42 = vsel %vm468_vm7, %v898_v26, %v907_v14  ;;  %v469_v52 = vsel %vm468_vm7, %v453_v8, %v467_v41  ;;  %v862_v53 = vadd.f32 %v854_v18, %v730_v48  ;;  %v415_v57 = vadd.f32 %v407_v34, %v283_v0 }
 0x10f   :  { %v902_v3 = vrot.slane %v862_v53, %v1330_v51  ;;  %v457_v58 = vrot.slane %v415_v57, %v1330_v51 }
 0x111   :  { %v471_v61 = vsel %vm470_vm8, %v457_v58, %v469_v52  ;;  %v909_v62 = vsel %vm470_vm8, %v902_v3, %v908_v42 }
 0x112   :  { %474 = vst.msk [vmem:[#allocation5] sm:$0xff] %vm473_vm9, %v471_v61  ;;  %912 = vst.msk [vmem:[#allocation5 + $0x8] sm:$0xff] %vm473_vm9, %v909_v62 }
 0x113   :  { %976 = shalt.err (!%p973_p12)
}
 0x114   :  { %s977_s9 = scalar_lea.hbm %s1405_s3, 256 }
 0x115   :  { %p978_p13 = scmp.ne.s32.totalorder %s1405_s3, %s977_s9  ;;  %p981_p0 = scmp.lt.u32.totalorder %s977_s9, %s1405_s3 }
 0x117   :  { %p983_p1 = pnand %p981_p0, %p978_p13 }
 0x119   :  { %986 = shalt.err (!%p983_p1)
}
 0x11a   :  { %924 = dma.vmem_to_hbm [thread:$0]  %s919_s5, 256, %s1405_s3, [#allocation4], %s992_s22, %s992_s22, %s993_s23  }
 0x11b   :  { %989 = dma.done.wait [#allocation4], 256  }
 0x11c   :  { %990 = vsyncadd [#allocation4], 4294967040 }
 0x11d   :  { %928 = vsyncpa [#allocation3], 1 }
 0x11e   :  { %929 = vsyncpa [#allocation4], 1 }

</bundles_post_ra>
